<compile_context>
chip_gen: v7x
topology: tpu7x:2x2x1
jax: 0.10.0
libtpu: 0.0.40
codegen_flags: <defaults>
</compile_context>

<pallas_src>
import jax
import jax.numpy as jnp
from jax.experimental import pallas as pl
from jax.experimental.pallas import tpu as pltpu

_LEFT_HALO = 8                     # sublane-aligned column offset of the image in scratch
_INV_SQRT2 = 0.7071067811865476


def _round_up(a, b):
    return (a + b - 1) // b * b


def _residual_block_kernel(x_ref, w_ref, cb_ref, scale_ref, bias_ref, o_ref, buf_ref):
    # x_ref  : (H, W, TC)   input tile (batch dim squeezed by BlockSpec)
    # w_ref  : (K, K, TC)   depthwise conv weights
    # cb_ref / scale_ref / bias_ref : (1, TC)  conv bias + folded BN affine
    # o_ref  : (H, W, TC)
    # buf_ref: (Hp, Wpb, TC) f32 scratch; the image centre lives at rows [pad, pad+H),
    #          cols [8, 8+W); everything else is a zero halo.
    H, W, TC = o_ref.shape
    K = w_ref.shape[0]
    pad = (K - 1) // 2
    Hp, Wpb, _ = buf_ref.shape
    L = _LEFT_HALO
    c0 = L - pad                   # output column j lives at accumulator column j + c0
    Wr = Wpb - L - W               # right halo width

    # ---- zero only the halo strips (centre is fully overwritten below) ----
    if pad > 0:
        buf_ref[pl.ds(0, pad), :, :] = jnp.zeros((pad, Wpb, TC), jnp.float32)
        buf_ref[pl.ds(pad + H, pad), :, :] = jnp.zeros((pad, Wpb, TC), jnp.float32)
        buf_ref[pl.ds(pad, H), pl.ds(0, L), :] = jnp.zeros((H, L, TC), jnp.float32)
        if Wr > 0:
            buf_ref[pl.ds(pad, H), pl.ds(L + W, Wr), :] = jnp.zeros((H, Wr, TC),
                                                                    jnp.float32)

    # ---- centre copy: one store at a sublane-aligned column offset (L = 8) ----
    buf_ref[pl.ds(pad, H), pl.ds(L, W), :] = x_ref[...].astype(jnp.float32)

    # ---- per-step parameter loads hoisted out of the row loop ----
    w_all = w_ref[...].astype(jnp.float32)         # (K, K, TC)
    cb = cb_ref[0, :].astype(jnp.float32)          # (TC,)
    scale = scale_ref[0, :].astype(jnp.float32)    # (TC,)
    bias = bias_ref[0, :].astype(jnp.float32)      # (TC,)

    def row_body(i, carry):
        # All K*K taps for output row i. acc is (Wpb, TC) f32 (few vregs) and stays
        # register-resident; each tap = (shared row load per kh) + kw-only sublane
        # roll (XLU) + multiply-add (VPU). No VMEM stores inside the tap loop.
        acc = None
        for kh in range(K):
            row = buf_ref[i + kh]                                    # (Wpb, TC)
            for kw in range(K):
                tap = row if kw == 0 else pltpu.roll(row, Wpb - kw, axis=0)
                term = tap * w_all[kh, kw]
                acc = term if acc is None else acc + term
        conv = acc[c0:c0 + W, :] + cb                                # (W, TC)
        # exact GELU (matches torch.nn.GELU(approximate='none'))
        g = 0.5 * conv * (1.0 + jax.lax.erf(conv * _INV_SQRT2))
        # BatchNorm2d (inference) folded per-channel affine
        y = g * scale + bias
        # Residual: fn(x) + x  (x re-read per row; no full f32 copy kept live)
        o_ref[i] = (y + x_ref[i].astype(jnp.float32)).astype(o_ref.dtype)
        return carry

    jax.lax.fori_loop(0, H, row_body, 0)


def _vmem_budget_bytes():
    cap = 64 * 2**20                       # conservative default (v7x per-core VMEM)
    try:
        cap = int(pltpu.get_tpu_info().vmem_capacity_bytes)
    except Exception:
        pass
    return int(cap * 0.7)                  # leave headroom for the compiler


def _tiling_plan(N, C, H, W, K, esz):
    """Pick the channel tile and vmem limit: lane-dense, fits a temp-aware per-step
    VMEM estimate, keeps the per-row accumulator register-resident, and keeps >= 2
    grid programs for v7x megacore when possible."""
    pad = (K - 1) // 2
    Hp = H + 2 * pad
    Wpb = _LEFT_HALO + _round_up(W + pad, 8)
    budget = _vmem_budget_bytes()

    def per_step_bytes(tc):
        blocks = 2 * 2 * H * W * tc * esz             # x + out blocks, double-buffered
        params = 2 * (K * K + 3) * tc * 4             # weights + bias/scale/bias
        scratch = Hp * Wpb * tc * 4                   # halo image
        temps = H * W * tc * 4 + 8 * Wpb * tc * 4     # centre-copy temp + row working set
        return blocks + params + scratch + temps

    def acc_vregs(tc):
        return (Wpb // 8) * max(1, (tc + 127) // 128)

    def usable(tc):
        return C % tc == 0 and per_step_bytes(tc) <= budget and acc_vregs(tc) <= 12

    tc = C
    if C % 128 == 0:
        cands = [t for t in range(min(C, 512), 127, -128) if usable(t)]
        tc = cands[0] if cands else 128
    # non-128-multiple channel counts use the full channel dim (lane-sparse but a
    # legal full-extent lane block; only hit by tiny / odd C such as the small test)

    # v7x has 2 TensorCores: avoid a degenerate single-program grid when we can split
    # channels and still keep a 128-multiple tile.
    if N * (C // tc) < 2 and tc % 256 == 0:
        tc //= 2

    vmem_limit = int(min(budget, max(32 * 2**20, 2 * per_step_bytes(tc))))
    return tc, vmem_limit


def residual_convmixer_block(x_nchw, w_dw, conv_b, gamma, beta, run_mean, run_var,
                             eps=1e-5):
    """Residual(fn)(x), fn = depthwise Conv2d('same') -> GELU -> BatchNorm2d (inference).

    x_nchw : (N, C, H, W) float32 (PyTorch layout)
    w_dw   : (C, 1, K, K) depthwise conv weight (PyTorch layout)
    """
    N, C, H, W = x_nchw.shape
    K = w_dw.shape[-1]
    assert K % 2 == 1, "padding='same' depthwise conv implemented for odd K only"
    assert K <= 2 * _LEFT_HALO + 1, "kernel size too large for the fixed 8-column halo"
    pad = (K - 1) // 2
    Hp = H + 2 * pad
    Wpb = _LEFT_HALO + _round_up(W + pad, 8)

    # Layout / parameter glue (no padded copy of the activation is materialised).
    x = jnp.transpose(x_nchw, (0, 2, 3, 1))                   # NHWC: channels on lanes
    w = jnp.transpose(w_dw.reshape(C, K, K), (1, 2, 0))       # (K, K, C)
    scale = (gamma / jnp.sqrt(run_var + eps)).reshape(1, C)
    bias = beta.reshape(1, C) - run_mean.reshape(1, C) * scale
    cb = conv_b.reshape(1, C)

    TC, vmem_limit = _tiling_plan(N, C, H, W, K, x.dtype.itemsize)
    grid = (N, C // TC)

    out = pl.pallas_call(
        _residual_block_kernel,
        out_shape=jax.ShapeDtypeStruct((N, H, W, C), x.dtype),
        grid_spec=pltpu.PrefetchScalarGridSpec(
            num_scalar_prefetch=0,
            grid=grid,
            in_specs=[
                pl.BlockSpec((None, H, W, TC), lambda n, c: (n, 0, 0, c)),
                pl.BlockSpec((K, K, TC), lambda n, c: (0, 0, c)),
                pl.BlockSpec((1, TC), lambda n, c: (0, c)),
                pl.BlockSpec((1, TC), lambda n, c: (0, c)),
                pl.BlockSpec((1, TC), lambda n, c: (0, c)),
            ],
            out_specs=pl.BlockSpec((None, H, W, TC), lambda n, c: (n, 0, 0, c)),
            scratch_shapes=[pltpu.VMEM((Hp, Wpb, TC), jnp.float32)],
        ),
        compiler_params=pltpu.CompilerParams(
            dimension_semantics=("parallel", "parallel"),
            vmem_limit_bytes=vmem_limit,
        ),
    )(x, w, cb, scale, bias)

    return jnp.transpose(out, (0, 3, 1, 2))   # back to NCHW


def _reference(x_nchw, w_dw, conv_b, gamma, beta, run_mean, run_var, eps=1e-5):
    """Pure-JAX reference of the same forward (NCHW)."""
    C = x_nchw.shape[1]
    y = jax.lax.conv_general_dilated(
        x_nchw, w_dw, window_strides=(1, 1), padding="SAME",
        dimension_numbers=("NCHW", "OIHW", "NCHW"), feature_group_count=C,
        precision=jax.lax.Precision.HIGHEST)
    y = y + conv_b.reshape(1, C, 1, 1)
    y = 0.5 * y * (1.0 + jax.lax.erf(y / jnp.sqrt(2.0)))
    scale = gamma / jnp.sqrt(run_var + eps)
    bias = beta - run_mean * scale
    y = y * scale.reshape(1, C, 1, 1) + bias.reshape(1, C, 1, 1)
    return y + x_nchw


def _run_case(key, N, C, H, W, K, atol):
    ks = jax.random.split(key, 7)
    x = jax.random.normal(ks[0], (N, C, H, W), jnp.float32)
    w_dw = 0.1 * jax.random.normal(ks[1], (C, 1, K, K), jnp.float32)
    conv_b = 0.1 * jax.random.normal(ks[2], (C,), jnp.float32)
    gamma = 1.0 + 0.1 * jax.random.normal(ks[3], (C,), jnp.float32)
    beta = 0.1 * jax.random.normal(ks[4], (C,), jnp.float32)
    run_mean = 0.1 * jax.random.normal(ks[5], (C,), jnp.float32)
    run_var = jnp.abs(1.0 + 0.1 * jax.random.normal(ks[6], (C,), jnp.float32))

    fn = jax.jit(residual_convmixer_block)
    out = jax.block_until_ready(fn(x, w_dw, conv_b, gamma, beta, run_mean, run_var))
    ref = _reference(x, w_dw, conv_b, gamma, beta, run_mean, run_var)
    assert out.shape == (N, C, H, W)
    err = float(jnp.max(jnp.abs(out - ref)))
    assert jnp.allclose(out, ref, atol=atol, rtol=atol), err


if __name__ == "__main__":
    key = jax.random.PRNGKey(0)
    k1, k2 = jax.random.split(key)
    # Small shapes implied by the module (batch=2, channels=4, spatial=16, K=5).
    _run_case(k1, N=2, C=4, H=16, W=16, K=5, atol=1e-4)
    # Realistic ConvMixer-ish case: exercises the lane-dense 128-multiple channel
    # tiling path and K=9 'same' padding.
    _run_case(k2, N=2, C=256, H=32, W=32, K=9, atol=2e-4)
    # TODO(synk): training-mode BatchNorm (batch statistics) not implemented;
    # inference running-stats semantics are used.
    print("KERNEL_OK")
</pallas_src>

<mosaic_0001>
module attributes {stable_mosaic.version = 11 : i64} {
  func.func @_residual_block_kernel(%arg0: i32, %arg1: i32, %arg2: memref<1x16x16x4xf32, #tpu.memory_space<vmem>>, %arg3: memref<5x5x4xf32, #tpu.memory_space<vmem>>, %arg4: memref<1x4xf32, #tpu.memory_space<vmem>>, %arg5: memref<1x4xf32, #tpu.memory_space<vmem>>, %arg6: memref<1x4xf32, #tpu.memory_space<vmem>>, %arg7: memref<1x16x16x4xf32, #tpu.memory_space<vmem>>, %arg8: memref<20x32x4xf32, #tpu.memory_space<vmem>>) attributes {dimension_semantics = [#tpu.dimension_semantics<parallel>, #tpu.dimension_semantics<parallel>], iteration_bounds = array<i64: 2, 1>, scalar_prefetch = 0 : i64, scratch_operands = 1 : i64, tpu.core_type = #tpu.core_type<tc>, window_params = [{transform_indices = @transform_0, window_bounds = array<i64: 1, 16, 16, 4>}, {transform_indices = @transform_1, window_bounds = array<i64: 5, 5, 4>}, {transform_indices = @transform_2, window_bounds = array<i64: 1, 4>}, {transform_indices = @transform_3, window_bounds = array<i64: 1, 4>}, {transform_indices = @transform_4, window_bounds = array<i64: 1, 4>}, {transform_indices = @transform_5, window_bounds = array<i64: 1, 16, 16, 4>}]} {
    %cst = arith.constant 0.000000e+00 : f32
    %0 = vector.broadcast %cst : f32 to vector<2x32x4xf32>
    %c0 = arith.constant 0 : index
    %c0_0 = arith.constant 0 : index
    %c0_1 = arith.constant 0 : index
    %1 = vector.load %arg8[%c0, %c0_0, %c0_1] : memref<20x32x4xf32, #tpu.memory_space<vmem>>, vector<2x32x4xf32>
    tpu.vector_store %arg8[%c0, %c0_0, %c0_1], %0 {strides = array<i32>} : memref<20x32x4xf32, #tpu.memory_space<vmem>>, vector<2x32x4xf32>,
    %cst_2 = arith.constant 0.000000e+00 : f32
    %2 = vector.broadcast %cst_2 : f32 to vector<2x32x4xf32>
    %c18 = arith.constant 18 : index
    %c0_3 = arith.constant 0 : index
    %c0_4 = arith.constant 0 : index
    %3 = vector.load %arg8[%c18, %c0_3, %c0_4] : memref<20x32x4xf32, #tpu.memory_space<vmem>>, vector<2x32x4xf32>
    tpu.vector_store %arg8[%c18, %c0_3, %c0_4], %2 {strides = array<i32>} : memref<20x32x4xf32, #tpu.memory_space<vmem>>, vector<2x32x4xf32>,
    %cst_5 = arith.constant 0.000000e+00 : f32
    %4 = vector.broadcast %cst_5 : f32 to vector<16x8x4xf32>
    %c2 = arith.constant 2 : index
    %c0_6 = arith.constant 0 : index
    %c0_7 = arith.constant 0 : index
    %5 = vector.load %arg8[%c2, %c0_6, %c0_7] : memref<20x32x4xf32, #tpu.memory_space<vmem>>, vector<16x8x4xf32>
    tpu.vector_store %arg8[%c2, %c0_6, %c0_7], %4 {strides = array<i32>} : memref<20x32x4xf32, #tpu.memory_space<vmem>>, vector<16x8x4xf32>,
    %cst_8 = arith.constant 0.000000e+00 : f32
    %6 = vector.broadcast %cst_8 : f32 to vector<16x8x4xf32>
    %c2_9 = arith.constant 2 : index
    %c24 = arith.constant 24 : index
    %c0_10 = arith.constant 0 : index
    %7 = vector.load %arg8[%c2_9, %c24, %c0_10] : memref<20x32x4xf32, #tpu.memory_space<vmem>>, vector<16x8x4xf32>
    tpu.vector_store %arg8[%c2_9, %c24, %c0_10], %6 {strides = array<i32>} : memref<20x32x4xf32, #tpu.memory_space<vmem>>, vector<16x8x4xf32>,
    %c0_11 = arith.constant 0 : index
    %c0_12 = arith.constant 0 : index
    %c0_13 = arith.constant 0 : index
    %c0_14 = arith.constant 0 : index
    %8 = vector.load %arg2[%c0_11, %c0_12, %c0_13, %c0_14] : memref<1x16x16x4xf32, #tpu.memory_space<vmem>>, vector<1x16x16x4xf32>
    %9 = vector.shape_cast %8 : vector<1x16x16x4xf32> to vector<16x16x4xf32>
    %c2_15 = arith.constant 2 : index
    %c8 = arith.constant 8 : index
    %c0_16 = arith.constant 0 : index
    %10 = vector.load %arg8[%c2_15, %c8, %c0_16] : memref<20x32x4xf32, #tpu.memory_space<vmem>>, vector<16x16x4xf32>
    tpu.vector_store %arg8[%c2_15, %c8, %c0_16], %9 {strides = array<i32>} : memref<20x32x4xf32, #tpu.memory_space<vmem>>, vector<16x16x4xf32>,
    %c0_17 = arith.constant 0 : index
    %c0_18 = arith.constant 0 : index
    %c0_19 = arith.constant 0 : index
    %11 = vector.load %arg3[%c0_17, %c0_18, %c0_19] : memref<5x5x4xf32, #tpu.memory_space<vmem>>, vector<5x5x4xf32>
    %c0_20 = arith.constant 0 : index
    %c0_21 = arith.constant 0 : index
    %12 = vector.load %arg4[%c0_20, %c0_21] : memref<1x4xf32, #tpu.memory_space<vmem>>, vector<1x4xf32>
    %13 = vector.shape_cast %12 : vector<1x4xf32> to vector<4xf32>
    %c0_22 = arith.constant 0 : index
    %c0_23 = arith.constant 0 : index
    %14 = vector.load %arg5[%c0_22, %c0_23] : memref<1x4xf32, #tpu.memory_space<vmem>>, vector<1x4xf32>
    %15 = vector.shape_cast %14 : vector<1x4xf32> to vector<4xf32>
    %c0_24 = arith.constant 0 : index
    %c0_25 = arith.constant 0 : index
    %16 = vector.load %arg6[%c0_24, %c0_25] : memref<1x4xf32, #tpu.memory_space<vmem>>, vector<1x4xf32>
    %17 = vector.shape_cast %16 : vector<1x4xf32> to vector<4xf32>
    %c0_i32 = arith.constant 0 : i32
    %c16_i32 = arith.constant 16 : i32
    %18 = arith.addi %c0_i32, %c16_i32 : i32
    %c1_i32 = arith.constant 1 : i32
    scf.for %arg9 = %c0_i32 to %18 step %c1_i32  : i32 {
      %c0_i32_27 = arith.constant 0 : i32
      %19 = arith.addi %arg9, %c0_i32_27 : i32
      %20 = arith.index_cast %19 : i32 to index
      %c0_28 = arith.constant 0 : index
      %c0_29 = arith.constant 0 : index
      %21 = vector.load %arg8[%20, %c0_28, %c0_29] : memref<20x32x4xf32, #tpu.memory_space<vmem>>, vector<1x32x4xf32>
      %22 = vector.shape_cast %21 : vector<1x32x4xf32> to vector<32x4xf32>
      %23 = vector.extract_strided_slice %11 {offsets = [0, 0, 0], sizes = [1, 1, 4], strides = [1, 1, 1]} : vector<5x5x4xf32> to vector<1x1x4xf32>
      %24 = vector.shape_cast %23 : vector<1x1x4xf32> to vector<4xf32>
      %25 = vector.shape_cast %24 : vector<4xf32> to vector<1x4xf32>
      %26 = vector.broadcast %25 : vector<1x4xf32> to vector<32x4xf32>
      %27 = arith.mulf %22, %26 : vector<32x4xf32>
      %c31_i32 = arith.constant 31 : i32
      %28 = tpu.dynamic_rotate %22 by %c31_i32 dim 0 : vector<32x4xf32>, i32 -> vector<32x4xf32>
      %29 = vector.extract_strided_slice %11 {offsets = [0, 1, 0], sizes = [1, 1, 4], strides = [1, 1, 1]} : vector<5x5x4xf32> to vector<1x1x4xf32>
      %30 = vector.shape_cast %29 : vector<1x1x4xf32> to vector<4xf32>
      %31 = vector.shape_cast %30 : vector<4xf32> to vector<1x4xf32>
      %32 = vector.broadcast %31 : vector<1x4xf32> to vector<32x4xf32>
      %33 = arith.mulf %28, %32 : vector<32x4xf32>
      %34 = arith.addf %27, %33 : vector<32x4xf32>
      %c30_i32 = arith.constant 30 : i32
      %35 = tpu.dynamic_rotate %22 by %c30_i32 dim 0 : vector<32x4xf32>, i32 -> vector<32x4xf32>
      %36 = vector.extract_strided_slice %11 {offsets = [0, 2, 0], sizes = [1, 1, 4], strides = [1, 1, 1]} : vector<5x5x4xf32> to vector<1x1x4xf32>
      %37 = vector.shape_cast %36 : vector<1x1x4xf32> to vector<4xf32>
      %38 = vector.shape_cast %37 : vector<4xf32> to vector<1x4xf32>
      %39 = vector.broadcast %38 : vector<1x4xf32> to vector<32x4xf32>
      %40 = arith.mulf %35, %39 : vector<32x4xf32>
      %41 = arith.addf %34, %40 : vector<32x4xf32>
      %c29_i32 = arith.constant 29 : i32
      %42 = tpu.dynamic_rotate %22 by %c29_i32 dim 0 : vector<32x4xf32>, i32 -> vector<32x4xf32>
      %43 = vector.extract_strided_slice %11 {offsets = [0, 3, 0], sizes = [1, 1, 4], strides = [1, 1, 1]} : vector<5x5x4xf32> to vector<1x1x4xf32>
      %44 = vector.shape_cast %43 : vector<1x1x4xf32> to vector<4xf32>
      %45 = vector.shape_cast %44 : vector<4xf32> to vector<1x4xf32>
      %46 = vector.broadcast %45 : vector<1x4xf32> to vector<32x4xf32>
      %47 = arith.mulf %42, %46 : vector<32x4xf32>
      %48 = arith.addf %41, %47 : vector<32x4xf32>
      %c28_i32 = arith.constant 28 : i32
      %49 = tpu.dynamic_rotate %22 by %c28_i32 dim 0 : vector<32x4xf32>, i32 -> vector<32x4xf32>
      %50 = vector.extract_strided_slice %11 {offsets = [0, 4, 0], sizes = [1, 1, 4], strides = [1, 1, 1]} : vector<5x5x4xf32> to vector<1x1x4xf32>
      %51 = vector.shape_cast %50 : vector<1x1x4xf32> to vector<4xf32>
      %52 = vector.shape_cast %51 : vector<4xf32> to vector<1x4xf32>
      %53 = vector.broadcast %52 : vector<1x4xf32> to vector<32x4xf32>
      %54 = arith.mulf %49, %53 : vector<32x4xf32>
      %55 = arith.addf %48, %54 : vector<32x4xf32>
      %c1_i32_30 = arith.constant 1 : i32
      %56 = arith.addi %arg9, %c1_i32_30 : i32
      %57 = arith.index_cast %56 : i32 to index
      %c0_31 = arith.constant 0 : index
      %c0_32 = arith.constant 0 : index
      %58 = vector.load %arg8[%57, %c0_31, %c0_32] : memref<20x32x4xf32, #tpu.memory_space<vmem>>, vector<1x32x4xf32>
      %59 = vector.shape_cast %58 : vector<1x32x4xf32> to vector<32x4xf32>
      %60 = vector.extract_strided_slice %11 {offsets = [1, 0, 0], sizes = [1, 1, 4], strides = [1, 1, 1]} : vector<5x5x4xf32> to vector<1x1x4xf32>
      %61 = vector.shape_cast %60 : vector<1x1x4xf32> to vector<4xf32>
      %62 = vector.shape_cast %61 : vector<4xf32> to vector<1x4xf32>
      %63 = vector.broadcast %62 : vector<1x4xf32> to vector<32x4xf32>
      %64 = arith.mulf %59, %63 : vector<32x4xf32>
      %65 = arith.addf %55, %64 : vector<32x4xf32>
      %c31_i32_33 = arith.constant 31 : i32
      %66 = tpu.dynamic_rotate %59 by %c31_i32_33 dim 0 : vector<32x4xf32>, i32 -> vector<32x4xf32>
      %67 = vector.extract_strided_slice %11 {offsets = [1, 1, 0], sizes = [1, 1, 4], strides = [1, 1, 1]} : vector<5x5x4xf32> to vector<1x1x4xf32>
      %68 = vector.shape_cast %67 : vector<1x1x4xf32> to vector<4xf32>
      %69 = vector.shape_cast %68 : vector<4xf32> to vector<1x4xf32>
      %70 = vector.broadcast %69 : vector<1x4xf32> to vector<32x4xf32>
      %71 = arith.mulf %66, %70 : vector<32x4xf32>
      %72 = arith.addf %65, %71 : vector<32x4xf32>
      %c30_i32_34 = arith.constant 30 : i32
      %73 = tpu.dynamic_rotate %59 by %c30_i32_34 dim 0 : vector<32x4xf32>, i32 -> vector<32x4xf32>
      %74 = vector.extract_strided_slice %11 {offsets = [1, 2, 0], sizes = [1, 1, 4], strides = [1, 1, 1]} : vector<5x5x4xf32> to vector<1x1x4xf32>
      %75 = vector.shape_cast %74 : vector<1x1x4xf32> to vector<4xf32>
      %76 = vector.shape_cast %75 : vector<4xf32> to vector<1x4xf32>
      %77 = vector.broadcast %76 : vector<1x4xf32> to vector<32x4xf32>
      %78 = arith.mulf %73, %77 : vector<32x4xf32>
      %79 = arith.addf %72, %78 : vector<32x4xf32>
      %c29_i32_35 = arith.constant 29 : i32
      %80 = tpu.dynamic_rotate %59 by %c29_i32_35 dim 0 : vector<32x4xf32>, i32 -> vector<32x4xf32>
      %81 = vector.extract_strided_slice %11 {offsets = [1, 3, 0], sizes = [1, 1, 4], strides = [1, 1, 1]} : vector<5x5x4xf32> to vector<1x1x4xf32>
      %82 = vector.shape_cast %81 : vector<1x1x4xf32> to vector<4xf32>
      %83 = vector.shape_cast %82 : vector<4xf32> to vector<1x4xf32>
      %84 = vector.broadcast %83 : vector<1x4xf32> to vector<32x4xf32>
      %85 = arith.mulf %80, %84 : vector<32x4xf32>
      %86 = arith.addf %79, %85 : vector<32x4xf32>
      %c28_i32_36 = arith.constant 28 : i32
      %87 = tpu.dynamic_rotate %59 by %c28_i32_36 dim 0 : vector<32x4xf32>, i32 -> vector<32x4xf32>
      %88 = vector.extract_strided_slice %11 {offsets = [1, 4, 0], sizes = [1, 1, 4], strides = [1, 1, 1]} : vector<5x5x4xf32> to vector<1x1x4xf32>
      %89 = vector.shape_cast %88 : vector<1x1x4xf32> to vector<4xf32>
      %90 = vector.shape_cast %89 : vector<4xf32> to vector<1x4xf32>
      %91 = vector.broadcast %90 : vector<1x4xf32> to vector<32x4xf32>
      %92 = arith.mulf %87, %91 : vector<32x4xf32>
      %93 = arith.addf %86, %92 : vector<32x4xf32>
      %c2_i32 = arith.constant 2 : i32
      %94 = arith.addi %arg9, %c2_i32 : i32
      %95 = arith.index_cast %94 : i32 to index
      %c0_37 = arith.constant 0 : index
      %c0_38 = arith.constant 0 : index
      %96 = vector.load %arg8[%95, %c0_37, %c0_38] : memref<20x32x4xf32, #tpu.memory_space<vmem>>, vector<1x32x4xf32>
      %97 = vector.shape_cast %96 : vector<1x32x4xf32> to vector<32x4xf32>
      %98 = vector.extract_strided_slice %11 {offsets = [2, 0, 0], sizes = [1, 1, 4], strides = [1, 1, 1]} : vector<5x5x4xf32> to vector<1x1x4xf32>
      %99 = vector.shape_cast %98 : vector<1x1x4xf32> to vector<4xf32>
      %100 = vector.shape_cast %99 : vector<4xf32> to vector<1x4xf32>
      %101 = vector.broadcast %100 : vector<1x4xf32> to vector<32x4xf32>
      %102 = arith.mulf %97, %101 : vector<32x4xf32>
      %103 = arith.addf %93, %102 : vector<32x4xf32>
      %c31_i32_39 = arith.constant 31 : i32
      %104 = tpu.dynamic_rotate %97 by %c31_i32_39 dim 0 : vector<32x4xf32>, i32 -> vector<32x4xf32>
      %105 = vector.extract_strided_slice %11 {offsets = [2, 1, 0], sizes = [1, 1, 4], strides = [1, 1, 1]} : vector<5x5x4xf32> to vector<1x1x4xf32>
      %106 = vector.shape_cast %105 : vector<1x1x4xf32> to vector<4xf32>
      %107 = vector.shape_cast %106 : vector<4xf32> to vector<1x4xf32>
      %108 = vector.broadcast %107 : vector<1x4xf32> to vector<32x4xf32>
      %109 = arith.mulf %104, %108 : vector<32x4xf32>
      %110 = arith.addf %103, %109 : vector<32x4xf32>
      %c30_i32_40 = arith.constant 30 : i32
      %111 = tpu.dynamic_rotate %97 by %c30_i32_40 dim 0 : vector<32x4xf32>, i32 -> vector<32x4xf32>
      %112 = vector.extract_strided_slice %11 {offsets = [2, 2, 0], sizes = [1, 1, 4], strides = [1, 1, 1]} : vector<5x5x4xf32> to vector<1x1x4xf32>
      %113 = vector.shape_cast %112 : vector<1x1x4xf32> to vector<4xf32>
      %114 = vector.shape_cast %113 : vector<4xf32> to vector<1x4xf32>
      %115 = vector.broadcast %114 : vector<1x4xf32> to vector<32x4xf32>
      %116 = arith.mulf %111, %115 : vector<32x4xf32>
      %117 = arith.addf %110, %116 : vector<32x4xf32>
      %c29_i32_41 = arith.constant 29 : i32
      %118 = tpu.dynamic_rotate %97 by %c29_i32_41 dim 0 : vector<32x4xf32>, i32 -> vector<32x4xf32>
      %119 = vector.extract_strided_slice %11 {offsets = [2, 3, 0], sizes = [1, 1, 4], strides = [1, 1, 1]} : vector<5x5x4xf32> to vector<1x1x4xf32>
      %120 = vector.shape_cast %119 : vector<1x1x4xf32> to vector<4xf32>
      %121 = vector.shape_cast %120 : vector<4xf32> to vector<1x4xf32>
      %122 = vector.broadcast %121 : vector<1x4xf32> to vector<32x4xf32>
      %123 = arith.mulf %118, %122 : vector<32x4xf32>
      %124 = arith.addf %117, %123 : vector<32x4xf32>
      %c28_i32_42 = arith.constant 28 : i32
      %125 = tpu.dynamic_rotate %97 by %c28_i32_42 dim 0 : vector<32x4xf32>, i32 -> vector<32x4xf32>
      %126 = vector.extract_strided_slice %11 {offsets = [2, 4, 0], sizes = [1, 1, 4], strides = [1, 1, 1]} : vector<5x5x4xf32> to vector<1x1x4xf32>
      %127 = vector.shape_cast %126 : vector<1x1x4xf32> to vector<4xf32>
      %128 = vector.shape_cast %127 : vector<4xf32> to vector<1x4xf32>
      %129 = vector.broadcast %128 : vector<1x4xf32> to vector<32x4xf32>
      %130 = arith.mulf %125, %129 : vector<32x4xf32>
      %131 = arith.addf %124, %130 : vector<32x4xf32>
      %c3_i32 = arith.constant 3 : i32
      %132 = arith.addi %arg9, %c3_i32 : i32
      %133 = arith.index_cast %132 : i32 to index
      %c0_43 = arith.constant 0 : index
      %c0_44 = arith.constant 0 : index
      %134 = vector.load %arg8[%133, %c0_43, %c0_44] : memref<20x32x4xf32, #tpu.memory_space<vmem>>, vector<1x32x4xf32>
      %135 = vector.shape_cast %134 : vector<1x32x4xf32> to vector<32x4xf32>
      %136 = vector.extract_strided_slice %11 {offsets = [3, 0, 0], sizes = [1, 1, 4], strides = [1, 1, 1]} : vector<5x5x4xf32> to vector<1x1x4xf32>
      %137 = vector.shape_cast %136 : vector<1x1x4xf32> to vector<4xf32>
      %138 = vector.shape_cast %137 : vector<4xf32> to vector<1x4xf32>
      %139 = vector.broadcast %138 : vector<1x4xf32> to vector<32x4xf32>
      %140 = arith.mulf %135, %139 : vector<32x4xf32>
      %141 = arith.addf %131, %140 : vector<32x4xf32>
      %c31_i32_45 = arith.constant 31 : i32
      %142 = tpu.dynamic_rotate %135 by %c31_i32_45 dim 0 : vector<32x4xf32>, i32 -> vector<32x4xf32>
      %143 = vector.extract_strided_slice %11 {offsets = [3, 1, 0], sizes = [1, 1, 4], strides = [1, 1, 1]} : vector<5x5x4xf32> to vector<1x1x4xf32>
      %144 = vector.shape_cast %143 : vector<1x1x4xf32> to vector<4xf32>
      %145 = vector.shape_cast %144 : vector<4xf32> to vector<1x4xf32>
      %146 = vector.broadcast %145 : vector<1x4xf32> to vector<32x4xf32>
      %147 = arith.mulf %142, %146 : vector<32x4xf32>
      %148 = arith.addf %141, %147 : vector<32x4xf32>
      %c30_i32_46 = arith.constant 30 : i32
      %149 = tpu.dynamic_rotate %135 by %c30_i32_46 dim 0 : vector<32x4xf32>, i32 -> vector<32x4xf32>
      %150 = vector.extract_strided_slice %11 {offsets = [3, 2, 0], sizes = [1, 1, 4], strides = [1, 1, 1]} : vector<5x5x4xf32> to vector<1x1x4xf32>
      %151 = vector.shape_cast %150 : vector<1x1x4xf32> to vector<4xf32>
      %152 = vector.shape_cast %151 : vector<4xf32> to vector<1x4xf32>
      %153 = vector.broadcast %152 : vector<1x4xf32> to vector<32x4xf32>
      %154 = arith.mulf %149, %153 : vector<32x4xf32>
      %155 = arith.addf %148, %154 : vector<32x4xf32>
      %c29_i32_47 = arith.constant 29 : i32
      %156 = tpu.dynamic_rotate %135 by %c29_i32_47 dim 0 : vector<32x4xf32>, i32 -> vector<32x4xf32>
      %157 = vector.extract_strided_slice %11 {offsets = [3, 3, 0], sizes = [1, 1, 4], strides = [1, 1, 1]} : vector<5x5x4xf32> to vector<1x1x4xf32>
      %158 = vector.shape_cast %157 : vector<1x1x4xf32> to vector<4xf32>
      %159 = vector.shape_cast %158 : vector<4xf32> to vector<1x4xf32>
      %160 = vector.broadcast %159 : vector<1x4xf32> to vector<32x4xf32>
      %161 = arith.mulf %156, %160 : vector<32x4xf32>
      %162 = arith.addf %155, %161 : vector<32x4xf32>
      %c28_i32_48 = arith.constant 28 : i32
      %163 = tpu.dynamic_rotate %135 by %c28_i32_48 dim 0 : vector<32x4xf32>, i32 -> vector<32x4xf32>
      %164 = vector.extract_strided_slice %11 {offsets = [3, 4, 0], sizes = [1, 1, 4], strides = [1, 1, 1]} : vector<5x5x4xf32> to vector<1x1x4xf32>
      %165 = vector.shape_cast %164 : vector<1x1x4xf32> to vector<4xf32>
      %166 = vector.shape_cast %165 : vector<4xf32> to vector<1x4xf32>
      %167 = vector.broadcast %166 : vector<1x4xf32> to vector<32x4xf32>
      %168 = arith.mulf %163, %167 : vector<32x4xf32>
      %169 = arith.addf %162, %168 : vector<32x4xf32>
      %c4_i32 = arith.constant 4 : i32
      %170 = arith.addi %arg9, %c4_i32 : i32
      %171 = arith.index_cast %170 : i32 to index
      %c0_49 = arith.constant 0 : index
      %c0_50 = arith.constant 0 : index
      %172 = vector.load %arg8[%171, %c0_49, %c0_50] : memref<20x32x4xf32, #tpu.memory_space<vmem>>, vector<1x32x4xf32>
      %173 = vector.shape_cast %172 : vector<1x32x4xf32> to vector<32x4xf32>
      %174 = vector.extract_strided_slice %11 {offsets = [4, 0, 0], sizes = [1, 1, 4], strides = [1, 1, 1]} : vector<5x5x4xf32> to vector<1x1x4xf32>
      %175 = vector.shape_cast %174 : vector<1x1x4xf32> to vector<4xf32>
      %176 = vector.shape_cast %175 : vector<4xf32> to vector<1x4xf32>
      %177 = vector.broadcast %176 : vector<1x4xf32> to vector<32x4xf32>
      %178 = arith.mulf %173, %177 : vector<32x4xf32>
      %179 = arith.addf %169, %178 : vector<32x4xf32>
      %c31_i32_51 = arith.constant 31 : i32
      %180 = tpu.dynamic_rotate %173 by %c31_i32_51 dim 0 : vector<32x4xf32>, i32 -> vector<32x4xf32>
      %181 = vector.extract_strided_slice %11 {offsets = [4, 1, 0], sizes = [1, 1, 4], strides = [1, 1, 1]} : vector<5x5x4xf32> to vector<1x1x4xf32>
      %182 = vector.shape_cast %181 : vector<1x1x4xf32> to vector<4xf32>
      %183 = vector.shape_cast %182 : vector<4xf32> to vector<1x4xf32>
      %184 = vector.broadcast %183 : vector<1x4xf32> to vector<32x4xf32>
      %185 = arith.mulf %180, %184 : vector<32x4xf32>
      %186 = arith.addf %179, %185 : vector<32x4xf32>
      %c30_i32_52 = arith.constant 30 : i32
      %187 = tpu.dynamic_rotate %173 by %c30_i32_52 dim 0 : vector<32x4xf32>, i32 -> vector<32x4xf32>
      %188 = vector.extract_strided_slice %11 {offsets = [4, 2, 0], sizes = [1, 1, 4], strides = [1, 1, 1]} : vector<5x5x4xf32> to vector<1x1x4xf32>
      %189 = vector.shape_cast %188 : vector<1x1x4xf32> to vector<4xf32>
      %190 = vector.shape_cast %189 : vector<4xf32> to vector<1x4xf32>
      %191 = vector.broadcast %190 : vector<1x4xf32> to vector<32x4xf32>
      %192 = arith.mulf %187, %191 : vector<32x4xf32>
      %193 = arith.addf %186, %192 : vector<32x4xf32>
      %c29_i32_53 = arith.constant 29 : i32
      %194 = tpu.dynamic_rotate %173 by %c29_i32_53 dim 0 : vector<32x4xf32>, i32 -> vector<32x4xf32>
      %195 = vector.extract_strided_slice %11 {offsets = [4, 3, 0], sizes = [1, 1, 4], strides = [1, 1, 1]} : vector<5x5x4xf32> to vector<1x1x4xf32>
      %196 = vector.shape_cast %195 : vector<1x1x4xf32> to vector<4xf32>
      %197 = vector.shape_cast %196 : vector<4xf32> to vector<1x4xf32>
      %198 = vector.broadcast %197 : vector<1x4xf32> to vector<32x4xf32>
      %199 = arith.mulf %194, %198 : vector<32x4xf32>
      %200 = arith.addf %193, %199 : vector<32x4xf32>
      %c28_i32_54 = arith.constant 28 : i32
      %201 = tpu.dynamic_rotate %173 by %c28_i32_54 dim 0 : vector<32x4xf32>, i32 -> vector<32x4xf32>
      %202 = vector.extract_strided_slice %11 {offsets = [4, 4, 0], sizes = [1, 1, 4], strides = [1, 1, 1]} : vector<5x5x4xf32> to vector<1x1x4xf32>
      %203 = vector.shape_cast %202 : vector<1x1x4xf32> to vector<4xf32>
      %204 = vector.shape_cast %203 : vector<4xf32> to vector<1x4xf32>
      %205 = vector.broadcast %204 : vector<1x4xf32> to vector<32x4xf32>
      %206 = arith.mulf %201, %205 : vector<32x4xf32>
      %207 = arith.addf %200, %206 : vector<32x4xf32>
      %208 = vector.extract_strided_slice %207 {offsets = [6, 0], sizes = [16, 4], strides = [1, 1]} : vector<32x4xf32> to vector<16x4xf32>
      %209 = vector.shape_cast %13 : vector<4xf32> to vector<1x4xf32>
      %210 = vector.broadcast %209 : vector<1x4xf32> to vector<16x4xf32>
      %211 = arith.addf %208, %210 : vector<16x4xf32>
      %cst_55 = arith.constant 5.000000e-01 : f32
      %212 = vector.broadcast %cst_55 : f32 to vector<16x4xf32>
      %213 = arith.mulf %212, %211 : vector<16x4xf32>
      %cst_56 = arith.constant 0.707106769 : f32
      %214 = vector.broadcast %cst_56 : f32 to vector<16x4xf32>
      %215 = arith.mulf %211, %214 : vector<16x4xf32>
      %216 = math.erf %215 : vector<16x4xf32>
      %cst_57 = arith.constant 1.000000e+00 : f32
      %217 = vector.broadcast %cst_57 : f32 to vector<16x4xf32>
      %218 = arith.addf %217, %216 : vector<16x4xf32>
      %219 = arith.mulf %213, %218 : vector<16x4xf32>
      %220 = vector.shape_cast %15 : vector<4xf32> to vector<1x4xf32>
      %221 = vector.broadcast %220 : vector<1x4xf32> to vector<16x4xf32>
      %222 = arith.mulf %219, %221 : vector<16x4xf32>
      %223 = vector.shape_cast %17 : vector<4xf32> to vector<1x4xf32>
      %224 = vector.broadcast %223 : vector<1x4xf32> to vector<16x4xf32>
      %225 = arith.addf %222, %224 : vector<16x4xf32>
      %c0_58 = arith.constant 0 : index
      %226 = arith.index_cast %arg9 : i32 to index
      %c0_59 = arith.constant 0 : index
      %c0_60 = arith.constant 0 : index
      %227 = vector.load %arg2[%c0_58, %226, %c0_59, %c0_60] : memref<1x16x16x4xf32, #tpu.memory_space<vmem>>, vector<1x1x16x4xf32>
      %228 = vector.shape_cast %227 : vector<1x1x16x4xf32> to vector<16x4xf32>
      %229 = arith.addf %225, %228 : vector<16x4xf32>
      %c0_61 = arith.constant 0 : index
      %230 = arith.index_cast %arg9 : i32 to index
      %c0_62 = arith.constant 0 : index
      %c0_63 = arith.constant 0 : index
      %231 = vector.load %arg7[%c0_61, %230, %c0_62, %c0_63] : memref<1x16x16x4xf32, #tpu.memory_space<vmem>>, vector<1x1x16x4xf32>
      %232 = vector.shape_cast %231 : vector<1x1x16x4xf32> to vector<16x4xf32>
      %233 = vector.shape_cast %229 : vector<16x4xf32> to vector<1x1x16x4xf32>
      tpu.vector_store %arg7[%c0_61, %230, %c0_62, %c0_63], %233 {strides = array<i32>} : memref<1x16x16x4xf32, #tpu.memory_space<vmem>>, vector<1x1x16x4xf32>,
    }
    %c16_i32_26 = arith.constant 16 : i32
    return
  }
  func.func @transform_0(%arg0: i32, %arg1: i32) -> (i32, i32, i32, i32) {
    %c0_i32 = arith.constant 0 : i32
    %c0_i32_0 = arith.constant 0 : i32
    %c0_i32_1 = arith.constant 0 : i32
    return %arg0, %c0_i32, %c0_i32_0, %arg1 : i32, i32, i32, i32
  }
  func.func @transform_1(%arg0: i32, %arg1: i32) -> (i32, i32, i32) {
    %c0_i32 = arith.constant 0 : i32
    %c0_i32_0 = arith.constant 0 : i32
    %c0_i32_1 = arith.constant 0 : i32
    return %c0_i32, %c0_i32_0, %arg1 : i32, i32, i32
  }
  func.func @transform_2(%arg0: i32, %arg1: i32) -> (i32, i32) {
    %c0_i32 = arith.constant 0 : i32
    %c0_i32_0 = arith.constant 0 : i32
    return %c0_i32, %arg1 : i32, i32
  }
  func.func @transform_3(%arg0: i32, %arg1: i32) -> (i32, i32) {
    %c0_i32 = arith.constant 0 : i32
    %c0_i32_0 = arith.constant 0 : i32
    return %c0_i32, %arg1 : i32, i32
  }
  func.func @transform_4(%arg0: i32, %arg1: i32) -> (i32, i32) {
    %c0_i32 = arith.constant 0 : i32
    %c0_i32_0 = arith.constant 0 : i32
    return %c0_i32, %arg1 : i32, i32
  }
  func.func @transform_5(%arg0: i32, %arg1: i32) -> (i32, i32, i32, i32) {
    %c0_i32 = arith.constant 0 : i32
    %c0_i32_0 = arith.constant 0 : i32
    %c0_i32_1 = arith.constant 0 : i32
    return %arg0, %c0_i32, %c0_i32_0, %arg1 : i32, i32, i32, i32
  }
}

</mosaic_0001>

<bundles_post_ra>
// kernel: residual_convmixer_block.1
= control target key start
LH: loop header
LB: loop body
LE: loop exit
PB: predicated region body
PF: predicated region fallthrough
CT: control target
= control target key end

     0   :  { %s1237_s18 = smov 0   ;;  %s1239_s19 = smov 0   ;;  %s1794_s0 = inlined_call_operand.vmem [shape: f32[2,16,16,4], index: 0, kind: input, shape index: {}]   ;;  %s1795_s1 = inlined_call_operand.vmem [shape: f32[5,5,4], index: 1, kind: input, shape index: {}]   ;;  %s1796_s2 = inlined_call_operand.vmem [shape: f32[1,4], index: 2, kind: input, shape index: {}]   ;;  %s1797_s3 = inlined_call_operand.vmem [shape: f32[1,4], index: 3, kind: input, shape index: {}]   ;;  %s1798_s4 = inlined_call_operand.vmem [shape: f32[1,4], index: 4, kind: input, shape index: {}]   ;;  %s1799_s5 = inlined_call_operand.vmem [shape: f32[2,16,16,4], index: 5, kind: output, shape index: {}]  }
   0x1   :  { %s1241_s20 = smov 0  }
   0x2 LB: > { %s27_s21 = sadd.s32 1, %s1196_s19  ;;  %p1101_p0 = scmp.ge.s32.totalorder %s1200_s20, 1  ;;  %s1200_s20 = sphi %s1241_s20, %s15_s20   ;;  %s1196_s19 = sphi %s1239_s19, %s1801_s19   ;;  %s1192_s18 = sphi %s1237_s18, %s1800_s18  }
   0x3   : > { %p29_p1 = scmp.ge.s32.totalorder %s27_s21, 2  ;;  %p239_p2 = scmp.lt.s32.totalorder %s1200_s20, 3 }
   0x5   : > { %s1803_s21 = smov (%p29_p1, %s27_s21), 0  ;;  %p240_p3 = pnand %p1101_p0, %p239_p2 }
   0x6   : > { %vm315_vm0 = vcmask (!%p240_p3), 31744   ;;  %v1260_v0 = vld [vmem:[%s1795_s1] sm:$0x1f] (!%p240_p3)  ;;  %v1265_v1 = vld [vmem:[%s1795_s1 + $0x8] sm:$0x1f] (!%p240_p3)  ;;  %v1206_v2 = vmov (!%p240_p3), 0.0  }
   0x7   : > { %243 = sbr.rel (%p240_p3) target bundleno = 162 (0xa2), region = 40  ;;  %316 = vst.msk [vmem:[#allocation2] sm:$0xff] (!%p240_p3), %vm315_vm0, %v1206_v2  ;;  %317 = vst.msk [vmem:[#allocation2 + $0x8] sm:$0xff] (!%p240_p3), %vm315_vm0, %v1206_v2  ;;  %v1318_v3 = vld [vmem:[%s1795_s1 + $0x10] sm:$0x1f] (!%p240_p3)  ;;  %p286_p4 = scmp.lt.s32.totalorder (!%p240_p3), %s1192_s18, 1 }
   0x8   : > { %318 = vst.msk [vmem:[#allocation2 + $0x10] sm:$0xff] (!%p240_p3), %vm315_vm0, %v1206_v2  ;;  %319 = vst.msk [vmem:[#allocation2 + $0x18] sm:$0xff] (!%p240_p3), %vm315_vm0, %v1206_v2  ;;  %v1323_v4 = vld [vmem:[%s1795_s1 + $0x18] sm:$0x1f] (!%p240_p3)  ;;  %v1328_v5 = vld [vmem:[%s1795_s1 + $0x20] sm:$0x1f] (!%p240_p3) }
   0x9   : > { %320 = vst.msk [vmem:[#allocation2 + $0x20] sm:$0xff] (!%p240_p3), %vm315_vm0, %v1206_v2  ;;  %321 = vst.msk [vmem:[#allocation2 + $0x28] sm:$0xff] (!%p240_p3), %vm315_vm0, %v1206_v2  ;;  %v1333_v6 = vld [vmem:[%s1796_s2] ss:$0 sm:$0xff] (!%p240_p3) }
   0xa   : > { %322 = vst.msk [vmem:[#allocation2 + $0x30] sm:$0xff] (!%p240_p3), %vm315_vm0, %v1206_v2  ;;  %323 = vst.msk [vmem:[#allocation2 + $0x38] sm:$0xff] (!%p240_p3), %vm315_vm0, %v1206_v2  ;;  %v1338_v7 = vld [vmem:[%s1797_s3] ss:$0 sm:$0xff] (!%p240_p3) }
   0xb   : > { %325 = vst.msk [vmem:[#allocation2 + $0x240] sm:$0xff] (!%p240_p3), %vm315_vm0, %v1206_v2  ;;  %326 = vst.msk [vmem:[#allocation2 + $0x248] sm:$0xff] (!%p240_p3), %vm315_vm0, %v1206_v2  ;;  %v1343_v8 = vld [vmem:[%s1798_s4] ss:$0 sm:$0xff] (!%p240_p3) }
   0xc   : > { %327 = vst.msk [vmem:[#allocation2 + $0x250] sm:$0xff] (!%p240_p3), %vm315_vm0, %v1206_v2  ;;  %328 = vst.msk [vmem:[#allocation2 + $0x258] sm:$0xff] (!%p240_p3), %vm315_vm0, %v1206_v2 }
   0xd   : > { %329 = vst.msk [vmem:[#allocation2 + $0x260] sm:$0xff] (!%p240_p3), %vm315_vm0, %v1206_v2  ;;  %330 = vst.msk [vmem:[#allocation2 + $0x268] sm:$0xff] (!%p240_p3), %vm315_vm0, %v1206_v2 }
   0xe   : > { %331 = vst.msk [vmem:[#allocation2 + $0x270] sm:$0xff] %vm315_vm0, %v1206_v2  ;;  %332 = vst.msk [vmem:[#allocation2 + $0x278] sm:$0xff] %vm315_vm0, %v1206_v2  ;;  %s1805_s18 = smov (!%p286_p4, %s1192_s18), 1 }
   0xf   : > { %334 = vst.msk [vmem:[#allocation2 + $0x40] sm:$0xff] %vm315_vm0, %v1206_v2  ;;  %335 = vst.msk [vmem:[#allocation2 + $0x60] sm:$0xff] %vm315_vm0, %v1206_v2  ;;  %s1133_s13 = sshll.u32 %s1805_s18, 8  ;;  %s1421_s18 = smov 0  }
  0x10   : > { %336 = vst.msk [vmem:[#allocation2 + $0x80] sm:$0xff] %vm315_vm0, %v1206_v2  ;;  %337 = vst.msk [vmem:[#allocation2 + $0xa0] sm:$0xff] %vm315_vm0, %v1206_v2  ;;  %s1350_s16 = scalar_lea.vmem %s1794_s0, %s1133_s13  ;;  %s1355_s23 = scalar_lea.vmem %s1799_s5, %s1133_s13 }
  0x11   : > { %338 = vst.msk [vmem:[#allocation2 + $0xc0] sm:$0xff] %vm315_vm0, %v1206_v2  ;;  %339 = vst.msk [vmem:[#allocation2 + $0xe0] sm:$0xff] %vm315_vm0, %v1206_v2  ;;  %v366_v9 = vld [vmem:[%s1350_s16] sm:$0xff]  ;;  %v367_v10 = vld [vmem:[%s1350_s16 + $0x8] sm:$0xff] }
  0x12   : > { %340 = vst.msk [vmem:[#allocation2 + $0x100] sm:$0xff] %vm315_vm0, %v1206_v2  ;;  %341 = vst.msk [vmem:[#allocation2 + $0x120] sm:$0xff] %vm315_vm0, %v1206_v2  ;;  %v368_v11 = vld [vmem:[%s1350_s16 + $0x10] sm:$0xff]  ;;  %v369_v12 = vld [vmem:[%s1350_s16 + $0x18] sm:$0xff] }
  0x13   : > { %342 = vst.msk [vmem:[#allocation2 + $0x140] sm:$0xff] %vm315_vm0, %v1206_v2  ;;  %343 = vst.msk [vmem:[#allocation2 + $0x160] sm:$0xff] %vm315_vm0, %v1206_v2  ;;  %v370_v13 = vld [vmem:[%s1350_s16 + $0x20] sm:$0xff]  ;;  %v371_v14 = vld [vmem:[%s1350_s16 + $0x28] sm:$0xff] }
  0x14   : > { %344 = vst.msk [vmem:[#allocation2 + $0x180] sm:$0xff] %vm315_vm0, %v1206_v2  ;;  %345 = vst.msk [vmem:[#allocation2 + $0x1a0] sm:$0xff] %vm315_vm0, %v1206_v2  ;;  %v372_v15 = vld [vmem:[%s1350_s16 + $0x30] sm:$0xff]  ;;  %v373_v16 = vld [vmem:[%s1350_s16 + $0x38] sm:$0xff] }
  0x15   : > { %346 = vst.msk [vmem:[#allocation2 + $0x1c0] sm:$0xff] %vm315_vm0, %v1206_v2  ;;  %347 = vst.msk [vmem:[#allocation2 + $0x1e0] sm:$0xff] %vm315_vm0, %v1206_v2  ;;  %v374_v17 = vld [vmem:[%s1350_s16 + $0x40] sm:$0xff]  ;;  %v375_v18 = vld [vmem:[%s1350_s16 + $0x48] sm:$0xff] }
  0x16   : > { %348 = vst.msk [vmem:[#allocation2 + $0x200] sm:$0xff] %vm315_vm0, %v1206_v2  ;;  %349 = vst.msk [vmem:[#allocation2 + $0x220] sm:$0xff] %vm315_vm0, %v1206_v2  ;;  %v376_v19 = vld [vmem:[%s1350_s16 + $0x50] sm:$0xff]  ;;  %v377_v20 = vld [vmem:[%s1350_s16 + $0x58] sm:$0xff] }
  0x17   : > { %350 = vst.msk [vmem:[#allocation2 + $0x58] sm:$0xff] %vm315_vm0, %v1206_v2  ;;  %351 = vst.msk [vmem:[#allocation2 + $0x78] sm:$0xff] %vm315_vm0, %v1206_v2  ;;  %v378_v21 = vld [vmem:[%s1350_s16 + $0x60] sm:$0xff]  ;;  %v379_v22 = vld [vmem:[%s1350_s16 + $0x68] sm:$0xff] }
  0x18   : > { %352 = vst.msk [vmem:[#allocation2 + $0x98] sm:$0xff] %vm315_vm0, %v1206_v2  ;;  %353 = vst.msk [vmem:[#allocation2 + $0xb8] sm:$0xff] %vm315_vm0, %v1206_v2  ;;  %v380_v23 = vld [vmem:[%s1350_s16 + $0x70] sm:$0xff]  ;;  %v381_v24 = vld [vmem:[%s1350_s16 + $0x78] sm:$0xff] }
  0x19   : > { %354 = vst.msk [vmem:[#allocation2 + $0xd8] sm:$0xff] %vm315_vm0, %v1206_v2  ;;  %355 = vst.msk [vmem:[#allocation2 + $0xf8] sm:$0xff] %vm315_vm0, %v1206_v2  ;;  %v382_v25 = vld [vmem:[%s1350_s16 + $0x80] sm:$0xff]  ;;  %v383_v26 = vld [vmem:[%s1350_s16 + $0x88] sm:$0xff] }
  0x1a   : > { %356 = vst.msk [vmem:[#allocation2 + $0x118] sm:$0xff] %vm315_vm0, %v1206_v2  ;;  %357 = vst.msk [vmem:[#allocation2 + $0x138] sm:$0xff] %vm315_vm0, %v1206_v2  ;;  %v384_v27 = vld [vmem:[%s1350_s16 + $0x90] sm:$0xff]  ;;  %v385_v28 = vld [vmem:[%s1350_s16 + $0x98] sm:$0xff] }
  0x1b   : > { %358 = vst.msk [vmem:[#allocation2 + $0x158] sm:$0xff] %vm315_vm0, %v1206_v2  ;;  %359 = vst.msk [vmem:[#allocation2 + $0x178] sm:$0xff] %vm315_vm0, %v1206_v2  ;;  %v386_v29 = vld [vmem:[%s1350_s16 + $0xa0] sm:$0xff]  ;;  %v387_v30 = vld [vmem:[%s1350_s16 + $0xa8] sm:$0xff] }
  0x1c   : > { %360 = vst.msk [vmem:[#allocation2 + $0x198] sm:$0xff] %vm315_vm0, %v1206_v2  ;;  %361 = vst.msk [vmem:[#allocation2 + $0x1b8] sm:$0xff] %vm315_vm0, %v1206_v2  ;;  %v388_v31 = vld [vmem:[%s1350_s16 + $0xb0] sm:$0xff]  ;;  %v389_v32 = vld [vmem:[%s1350_s16 + $0xb8] sm:$0xff] }
  0x1d   : > { %362 = vst.msk [vmem:[#allocation2 + $0x1d8] sm:$0xff] %vm315_vm0, %v1206_v2  ;;  %363 = vst.msk [vmem:[#allocation2 + $0x1f8] sm:$0xff] %vm315_vm0, %v1206_v2  ;;  %v390_v33 = vld [vmem:[%s1350_s16 + $0xc0] sm:$0xff]  ;;  %v391_v34 = vld [vmem:[%s1350_s16 + $0xc8] sm:$0xff] }
  0x1e   : > { %364 = vst.msk [vmem:[#allocation2 + $0x218] sm:$0xff] %vm315_vm0, %v1206_v2  ;;  %365 = vst.msk [vmem:[#allocation2 + $0x238] sm:$0xff] %vm315_vm0, %v1206_v2  ;;  %v392_v35 = vld [vmem:[%s1350_s16 + $0xd0] sm:$0xff]  ;;  %v393_v36 = vld [vmem:[%s1350_s16 + $0xd8] sm:$0xff] }
  0x1f   : > { %398 = vst.msk [vmem:[#allocation2 + $0x48] sm:$0xff] %vm315_vm0, %v366_v9  ;;  %399 = vst.msk [vmem:[#allocation2 + $0x50] sm:$0xff] %vm315_vm0, %v367_v10  ;;  %v394_v37 = vld [vmem:[%s1350_s16 + $0xe0] sm:$0xff]  ;;  %v395_v38 = vld [vmem:[%s1350_s16 + $0xe8] sm:$0xff] }
  0x20   : > { %400 = vst.msk [vmem:[#allocation2 + $0x68] sm:$0xff] %vm315_vm0, %v368_v11  ;;  %401 = vst.msk [vmem:[#allocation2 + $0x70] sm:$0xff] %vm315_vm0, %v369_v12  ;;  %v396_v39 = vld [vmem:[%s1350_s16 + $0xf0] sm:$0xff]  ;;  %v397_v40 = vld [vmem:[%s1350_s16 + $0xf8] sm:$0xff] }
  0x21   : > { %402 = vst.msk [vmem:[#allocation2 + $0x88] sm:$0xff] %vm315_vm0, %v370_v13  ;;  %403 = vst.msk [vmem:[#allocation2 + $0x90] sm:$0xff] %vm315_vm0, %v371_v14 }
  0x22   : > { %404 = vst.msk [vmem:[#allocation2 + $0xa8] sm:$0xff] %vm315_vm0, %v372_v15  ;;  %405 = vst.msk [vmem:[#allocation2 + $0xb0] sm:$0xff] %vm315_vm0, %v373_v16 }
  0x23   : > { %406 = vst.msk [vmem:[#allocation2 + $0xc8] sm:$0xff] %vm315_vm0, %v374_v17  ;;  %407 = vst.msk [vmem:[#allocation2 + $0xd0] sm:$0xff] %vm315_vm0, %v375_v18 }
  0x24   : > { %408 = vst.msk [vmem:[#allocation2 + $0xe8] sm:$0xff] %vm315_vm0, %v376_v19  ;;  %409 = vst.msk [vmem:[#allocation2 + $0xf0] sm:$0xff] %vm315_vm0, %v377_v20 }
  0x25   : > { %410 = vst.msk [vmem:[#allocation2 + $0x108] sm:$0xff] %vm315_vm0, %v378_v21  ;;  %411 = vst.msk [vmem:[#allocation2 + $0x110] sm:$0xff] %vm315_vm0, %v379_v22 }
  0x26   : > { %412 = vst.msk [vmem:[#allocation2 + $0x128] sm:$0xff] %vm315_vm0, %v380_v23  ;;  %413 = vst.msk [vmem:[#allocation2 + $0x130] sm:$0xff] %vm315_vm0, %v381_v24 }
  0x27   : > { %414 = vst.msk [vmem:[#allocation2 + $0x148] sm:$0xff] %vm315_vm0, %v382_v25  ;;  %415 = vst.msk [vmem:[#allocation2 + $0x150] sm:$0xff] %vm315_vm0, %v383_v26 }
  0x28   : > { %416 = vst.msk [vmem:[#allocation2 + $0x168] sm:$0xff] %vm315_vm0, %v384_v27  ;;  %417 = vst.msk [vmem:[#allocation2 + $0x170] sm:$0xff] %vm315_vm0, %v385_v28 }
  0x29   : > { %418 = vst.msk [vmem:[#allocation2 + $0x188] sm:$0xff] %vm315_vm0, %v386_v29  ;;  %419 = vst.msk [vmem:[#allocation2 + $0x190] sm:$0xff] %vm315_vm0, %v387_v30 }
  0x2a   : > { %420 = vst.msk [vmem:[#allocation2 + $0x1a8] sm:$0xff] %vm315_vm0, %v388_v31  ;;  %421 = vst.msk [vmem:[#allocation2 + $0x1b0] sm:$0xff] %vm315_vm0, %v389_v32 }
  0x2b   : > { %422 = vst.msk [vmem:[#allocation2 + $0x1c8] sm:$0xff] %vm315_vm0, %v390_v33  ;;  %423 = vst.msk [vmem:[#allocation2 + $0x1d0] sm:$0xff] %vm315_vm0, %v391_v34 }
  0x2c   : > { %424 = vst.msk [vmem:[#allocation2 + $0x1e8] sm:$0xff] %vm315_vm0, %v392_v35  ;;  %425 = vst.msk [vmem:[#allocation2 + $0x1f0] sm:$0xff] %vm315_vm0, %v393_v36 }
  0x2d   : > { %426 = vst.msk [vmem:[#allocation2 + $0x208] sm:$0xff] %vm315_vm0, %v394_v37  ;;  %427 = vst.msk [vmem:[#allocation2 + $0x210] sm:$0xff] %vm315_vm0, %v395_v38 }
  0x2e   : > { %428 = vst.msk [vmem:[#allocation2 + $0x228] sm:$0xff] %vm315_vm0, %v396_v39  ;;  %429 = vst.msk [vmem:[#allocation2 + $0x230] sm:$0xff] %vm315_vm0, %v397_v40 }
  0x2f LB: >> { %v450_v41 = vlaneseq  ;;  %s1106_s24 = sshll.u32 %s1204_s18, 5  ;;  %s1130_s26 = sshll.u32 %s1204_s18, 4  ;;  %vm919_vm5 = vcmask 1045504   ;;  %vm930_vm6 = vcmask 31750   ;;  %vm933_vm7 = vcmask 29696   ;;  %s1204_s18 = sphi %s1421_s18, %s443_s18  }
  0x30   : >> { %s1429_s25 = scalar_lea.vmem [#allocation2], %s1106_s24  ;;  %s914_s27 = scalar_lea.vmem %s1350_s16, %s1130_s26 }
  0x31   : >> { %v1427_v42 = vshrl.u32 %v450_v41, 7  ;;  %s929_s28 = scalar_lea.vmem %s1355_s23, %s1130_s26  ;;  %s443_s18 = sadd.s32 1, %s1204_s18  }
  0x32   : >> { %p440_p5 = scmp.ge.s32.totalorder %s443_s18, 16  }
  0x33   : >> { %v1441_v46 = vsub.s32 0, %v1427_v42  ;;  %vm463_vm1 = vcmp.lt.s32.totalorder %v1427_v42, 7  ;;  %v1445_v47 = vsub.s32 1, %v1427_v42  ;;  %vm481_vm2 = vcmp.lt.s32.totalorder %v1427_v42, 6 }
  0x34   : >> { %v1475_v15 = vsub.s32 2, %v1427_v42  ;;  %vm499_vm3 = vcmp.lt.s32.totalorder %v1427_v42, 5  ;;  %v1484_v24 = vsub.s32 3, %v1427_v42  ;;  %vm517_vm4 = vcmp.lt.s32.totalorder %v1427_v42, 4 }
  0x35   : >> { %v1432_v43 = vld [vmem:[%s1429_s25] sm:$0xff]  ;;  %v1435_v44 = vld [vmem:[%s1429_s25 + $0x8] sm:$0xff]  ;;  %v1438_v45 = vld [vmem:[%s1429_s25 + $0x10] sm:$0xff]  ;;  %v453_v53 = vrot.slane %v1260_v0, %v1441_v46  ;;  %v470_v55 = vrot.slane %v1260_v0, %v1445_v47 }
  0x36   : >> { %v449_v48 = vld [vmem:[%s1429_s25 + $0x18] sm:$0xff]  ;;  %v457_v49 = vrot.slane %v1432_v43, 1  ;;  %v458_v50 = vrot.slane %v1435_v44, 1  ;;  %v459_v51 = vrot.slane %v1438_v45, 1  ;;  %v477_v52 = vrot.slane %v1432_v43, 2 }
  0x37   : >> { %v460_v54 = vrot.slane %v449_v48, 1  ;;  %v478_v56 = vrot.slane %v1435_v44, 2  ;;  %v479_v59 = vrot.slane %v1438_v45, 2  ;;  %v480_v60 = vrot.slane %v449_v48, 2 }
  0x38   : >> { %v465_v57 = vsel %vm463_vm1, %v458_v50, %v459_v51  ;;  %v466_v58 = vsel %vm463_vm1, %v457_v49, %v458_v50  ;;  %v454_v61 = vmul.f32 %v453_v53, %v1432_v43  ;;  %v455_v62 = vmul.f32 %v453_v53, %v1435_v44  ;;  %v1505_v49 = vld [vmem:[%s1429_s25 + $0x30] sm:$0xff] }
  0x39   : >> { %v456_v63 = vmul.f32 %v453_v53, %v1438_v45  ;;  %v464_v2 = vsel %vm463_vm1, %v459_v51, %v460_v54  ;;  %v471_v9 = vmul.f32 %v470_v55, %v466_v58  ;;  %v472_v10 = vmul.f32 %v470_v55, %v465_v57 }
  0x3a   : >> { %v473_v11 = vmul.f32 %v470_v55, %v464_v2  ;;  %v482_v12 = vsel %vm481_vm2, %v479_v59, %v480_v60  ;;  %v483_v13 = vsel %vm481_vm2, %v478_v56, %v479_v59  ;;  %v484_v14 = vsel %vm481_vm2, %v477_v52, %v478_v56  ;;  %v1517_v52 = vld [vmem:[%s1429_s25 + $0x38] sm:$0xff] }
  0x3b   : >> { %v474_v16 = vadd.f32 %v471_v9, %v454_v61  ;;  %v475_v17 = vadd.f32 %v472_v10, %v455_v62  ;;  %v495_v19 = vrot.slane %v1432_v43, 3  ;;  %v488_v20 = vrot.slane %v1260_v0, %v1475_v15 }
  0x3c   : >> { %v476_v18 = vadd.f32 %v473_v11, %v456_v63  ;;  %v496_v21 = vrot.slane %v1435_v44, 3  ;;  %v497_v22 = vrot.slane %v1438_v45, 3  ;;  %v498_v23 = vrot.slane %v449_v48, 3 }
  0x3d   : >> { %v513_v25 = vrot.slane %v1432_v43, 4  ;;  %v514_v26 = vrot.slane %v1435_v44, 4  ;;  %v489_v27 = vmul.f32 %v488_v20, %v484_v14  ;;  %v490_v28 = vmul.f32 %v488_v20, %v483_v13  ;;  %v1499_v43 = vld [vmem:[%s1429_s25 + $0x20] sm:$0xff]  ;;  %v1502_v44 = vld [vmem:[%s1429_s25 + $0x28] sm:$0xff] }
  0x3e   : >> { %v491_v29 = vmul.f32 %v488_v20, %v482_v12  ;;  %v500_v30 = vsel %vm499_vm3, %v497_v22, %v498_v23  ;;  %v501_v31 = vsel %vm499_vm3, %v496_v21, %v497_v22  ;;  %v502_v32 = vsel %vm499_vm3, %v495_v19, %v496_v21 }
  0x3f   : >> { %v506_v33 = vrot.slane %v1260_v0, %v1484_v24  ;;  %v515_v34 = vrot.slane %v1438_v45, 4  ;;  %v492_v35 = vadd.f32 %v489_v27, %v474_v16  ;;  %v493_v36 = vadd.f32 %v490_v28, %v475_v17 }
  0x40   : >> { %v494_v37 = vadd.f32 %v491_v29, %v476_v18  ;;  %v516_v38 = vrot.slane %v449_v48, 4  ;;  %v520_v48 = vsel %vm517_vm4, %v513_v25, %v514_v26  ;;  %v1514_v51 = vsub.s32 4, %v1427_v42 }
  0x41   : >> { %v507_v39 = vmul.f32 %v506_v33, %v502_v32  ;;  %v508_v40 = vmul.f32 %v506_v33, %v501_v31  ;;  %v509_v41 = vmul.f32 %v506_v33, %v500_v30  ;;  %v519_v45 = vsel %vm517_vm4, %v514_v26, %v515_v34 }
  0x42   : >> { %v518_v50 = vsel %vm517_vm4, %v515_v34, %v516_v38  ;;  %v541_v56 = vrot.slane %v1265_v1, %v1441_v46  ;;  %v524_v57 = vrot.slane %v1260_v0, %v1514_v51  ;;  %v548_v58 = vrot.slane %v1499_v43, 1 }
  0x43   : >> { %v510_v53 = vadd.f32 %v507_v39, %v492_v35  ;;  %v511_v54 = vadd.f32 %v508_v40, %v493_v36  ;;  %v512_v55 = vadd.f32 %v509_v41, %v494_v37  ;;  %v549_v59 = vrot.slane %v1502_v44, 1 }
  0x44   : >> { %v550_v60 = vrot.slane %v1505_v49, 1  ;;  %v542_v61 = vmul.f32 %v1499_v43, %v541_v56  ;;  %v543_v62 = vmul.f32 %v1502_v44, %v541_v56  ;;  %v544_v63 = vmul.f32 %v1505_v49, %v541_v56 }
  0x45   : >> { %v551_v2 = vrot.slane %v1517_v52, 1  ;;  %v525_v9 = vmul.f32 %v524_v57, %v520_v48  ;;  %v526_v10 = vmul.f32 %v524_v57, %v519_v45  ;;  %v527_v11 = vmul.f32 %v524_v57, %v518_v50 }
  0x46   : >> { %v553_v12 = vsel %vm463_vm1, %v549_v59, %v550_v60  ;;  %v554_v14 = vsel %vm463_vm1, %v548_v58, %v549_v59  ;;  %v558_v16 = vrot.slane %v1265_v1, %v1445_v47  ;;  %v565_v17 = vrot.slane %v1499_v43, 2 }
  0x47   : >> { %v552_v13 = vsel %vm463_vm1, %v550_v60, %v551_v2  ;;  %v528_v18 = vadd.f32 %v525_v9, %v510_v53  ;;  %v529_v19 = vadd.f32 %v526_v10, %v511_v54  ;;  %v530_v20 = vadd.f32 %v527_v11, %v512_v55  ;;  %v1567_v10 = vld [vmem:[%s1429_s25 + $0x40] sm:$0xff] }
  0x48   : >> { %v566_v21 = vrot.slane %v1502_v44, 2  ;;  %v559_v22 = vmul.f32 %v558_v16, %v554_v14  ;;  %v560_v23 = vmul.f32 %v558_v16, %v553_v12  ;;  %v561_v25 = vmul.f32 %v558_v16, %v552_v13  ;;  %v1574_v14 = vld [vmem:[%s1429_s25 + $0x48] sm:$0xff]  ;;  %v1577_v16 = vld [vmem:[%s1429_s25 + $0x50] sm:$0xff] }
  0x49   : >> { %v567_v26 = vrot.slane %v1505_v49, 2  ;;  %v545_v27 = vadd.f32 %v542_v61, %v528_v18  ;;  %v546_v28 = vadd.f32 %v543_v62, %v529_v19  ;;  %v547_v29 = vadd.f32 %v544_v63, %v530_v20 }
  0x4a   : >> { %v568_v30 = vrot.slane %v1517_v52, 2  ;;  %v571_v32 = vsel %vm481_vm2, %v565_v17, %v566_v21  ;;  %v575_v33 = vrot.slane %v1265_v1, %v1475_v15  ;;  %v582_v34 = vrot.slane %v1499_v43, 3 }
  0x4b   : >> { %v570_v31 = vsel %vm481_vm2, %v566_v21, %v567_v26  ;;  %v562_v35 = vadd.f32 %v559_v22, %v545_v27  ;;  %v563_v36 = vadd.f32 %v560_v23, %v546_v28  ;;  %v564_v37 = vadd.f32 %v561_v25, %v547_v29  ;;  %v1586_v22 = vld [vmem:[%s1429_s25 + $0x58] sm:$0xff] }
  0x4c   : >> { %v569_v38 = vsel %vm481_vm2, %v567_v26, %v568_v30  ;;  %v576_v39 = vmul.f32 %v575_v33, %v571_v32  ;;  %v577_v40 = vmul.f32 %v575_v33, %v570_v31  ;;  %v583_v50 = vrot.slane %v1502_v44, 3 }
  0x4d   : >> { %v578_v41 = vmul.f32 %v575_v33, %v569_v38  ;;  %v584_v45 = vrot.slane %v1505_v49, 3  ;;  %v585_v48 = vrot.slane %v1517_v52, 3  ;;  %v592_v53 = vrot.slane %v1265_v1, %v1484_v24 }
  0x4e   : >> { %v599_v54 = vrot.slane %v1499_v43, 4  ;;  %v579_v55 = vadd.f32 %v576_v39, %v562_v35  ;;  %v580_v56 = vadd.f32 %v577_v40, %v563_v36  ;;  %v588_v58 = vsel %vm499_vm3, %v582_v34, %v583_v50 }
  0x4f   : >> { %v581_v57 = vadd.f32 %v578_v41, %v564_v37  ;;  %v586_v59 = vsel %vm499_vm3, %v584_v45, %v585_v48  ;;  %v587_v60 = vsel %vm499_vm3, %v583_v50, %v584_v45  ;;  %v593_v61 = vmul.f32 %v592_v53, %v588_v58 }
  0x50   : >> { %v600_v62 = vrot.slane %v1502_v44, 4  ;;  %v594_v63 = vmul.f32 %v592_v53, %v587_v60  ;;  %v595_v2 = vmul.f32 %v592_v53, %v586_v59  ;;  %v601_v43 = vrot.slane %v1505_v49, 4 }
  0x51   : >> { %v602_v9 = vrot.slane %v1517_v52, 4  ;;  %v596_v11 = vadd.f32 %v593_v61, %v579_v55  ;;  %v609_v13 = vrot.slane %v1265_v1, %v1514_v51  ;;  %v626_v44 = vrot.slane %v1318_v3, %v1441_v46 }
  0x52   : >> { %v605_v12 = vsel %vm517_vm4, %v599_v54, %v600_v62  ;;  %v597_v49 = vadd.f32 %v594_v63, %v580_v56  ;;  %v598_v17 = vadd.f32 %v595_v2, %v581_v57  ;;  %v604_v18 = vsel %vm517_vm4, %v600_v62, %v601_v43 }
  0x53   : >> { %v603_v52 = vsel %vm517_vm4, %v601_v43, %v602_v9  ;;  %v610_v19 = vmul.f32 %v609_v13, %v605_v12  ;;  %v611_v20 = vmul.f32 %v609_v13, %v604_v18  ;;  %v627_v23 = vmul.f32 %v1567_v10, %v626_v44 }
  0x54   : >> { %v612_v21 = vmul.f32 %v609_v13, %v603_v52  ;;  %v628_v25 = vmul.f32 %v1574_v14, %v626_v44  ;;  %v629_v26 = vmul.f32 %v1577_v16, %v626_v44  ;;  %v633_v27 = vrot.slane %v1567_v10, 1 }
  0x55   : >> { %v634_v28 = vrot.slane %v1574_v14, 1  ;;  %v613_v29 = vadd.f32 %v610_v19, %v596_v11  ;;  %v614_v30 = vadd.f32 %v611_v20, %v597_v49  ;;  %v635_v32 = vrot.slane %v1577_v16, 1 }
  0x56   : >> { %v615_v31 = vadd.f32 %v612_v21, %v598_v17  ;;  %v636_v33 = vrot.slane %v1586_v22, 1  ;;  %v643_v35 = vrot.slane %v1318_v3, %v1445_v47  ;;  %v650_v36 = vrot.slane %v1567_v10, 2 }
  0x57   : >> { %v639_v34 = vsel %vm463_vm1, %v633_v27, %v634_v28  ;;  %v630_v37 = vadd.f32 %v627_v23, %v613_v29  ;;  %v631_v38 = vadd.f32 %v628_v25, %v614_v30  ;;  %v638_v40 = vsel %vm463_vm1, %v634_v28, %v635_v32  ;;  %v1634_v30 = vld [vmem:[%s1429_s25 + $0x60] sm:$0xff] }
  0x58   : >> { %v632_v39 = vadd.f32 %v629_v26, %v615_v31  ;;  %v637_v41 = vsel %vm463_vm1, %v635_v32, %v636_v33  ;;  %v644_v50 = vmul.f32 %v643_v35, %v639_v34  ;;  %v645_v45 = vmul.f32 %v643_v35, %v638_v40  ;;  %v1637_v31 = vld [vmem:[%s1429_s25 + $0x68] sm:$0xff] }
  0x59   : >> { %v651_v48 = vrot.slane %v1574_v14, 2  ;;  %v646_v53 = vmul.f32 %v643_v35, %v637_v41  ;;  %v652_v54 = vrot.slane %v1577_v16, 2  ;;  %v653_v55 = vrot.slane %v1586_v22, 2  ;;  %v1642_v35 = vld [vmem:[%s1429_s25 + $0x70] sm:$0xff] }
  0x5a   : >> { %v660_v56 = vrot.slane %v1318_v3, %v1475_v15  ;;  %v647_v57 = vadd.f32 %v644_v50, %v630_v37  ;;  %v648_v58 = vadd.f32 %v645_v45, %v631_v38  ;;  %v667_v60 = vrot.slane %v1567_v10, 3  ;;  %v1651_v38 = vld [vmem:[%s1429_s25 + $0x78] sm:$0xff] }
  0x5b   : >> { %v656_v59 = vsel %vm481_vm2, %v650_v36, %v651_v48  ;;  %v649_v61 = vadd.f32 %v646_v53, %v632_v39  ;;  %v654_v62 = vsel %vm481_vm2, %v652_v54, %v653_v55  ;;  %v655_v63 = vsel %vm481_vm2, %v651_v48, %v652_v54 }
  0x5c   : >> { %v661_v2 = vmul.f32 %v660_v56, %v656_v59  ;;  %v662_v43 = vmul.f32 %v660_v56, %v655_v63  ;;  %v663_v9 = vmul.f32 %v660_v56, %v654_v62  ;;  %v668_v11 = vrot.slane %v1574_v14, 3 }
  0x5d   : >> { %v669_v12 = vrot.slane %v1577_v16, 3  ;;  %v670_v44 = vrot.slane %v1586_v22, 3  ;;  %v677_v49 = vrot.slane %v1318_v3, %v1484_v24  ;;  %v684_v17 = vrot.slane %v1567_v10, 4 }
  0x5e   : >> { %v664_v13 = vadd.f32 %v661_v2, %v647_v57  ;;  %v665_v52 = vadd.f32 %v662_v43, %v648_v58  ;;  %v666_v18 = vadd.f32 %v663_v9, %v649_v61  ;;  %v673_v20 = vsel %vm499_vm3, %v667_v60, %v668_v11 }
  0x5f   : >> { %v672_v19 = vsel %vm499_vm3, %v668_v11, %v669_v12  ;;  %v671_v21 = vsel %vm499_vm3, %v669_v12, %v670_v44  ;;  %v678_v23 = vmul.f32 %v677_v49, %v673_v20  ;;  %v685_v26 = vrot.slane %v1574_v14, 4 }
  0x60   : >> { %v679_v25 = vmul.f32 %v677_v49, %v672_v19  ;;  %v680_v27 = vmul.f32 %v677_v49, %v671_v21  ;;  %v686_v10 = vrot.slane %v1577_v16, 4  ;;  %v687_v28 = vrot.slane %v1586_v22, 4 }
  0x61   : >> { %v694_v29 = vrot.slane %v1318_v3, %v1514_v51  ;;  %v681_v32 = vadd.f32 %v678_v23, %v664_v13  ;;  %v690_v34 = vsel %vm517_vm4, %v684_v17, %v685_v26  ;;  %v711_v14 = vrot.slane %v1323_v4, %v1441_v46 }
  0x62   : >> { %v682_v33 = vadd.f32 %v679_v25, %v665_v52  ;;  %v683_v16 = vadd.f32 %v680_v27, %v666_v18  ;;  %v688_v22 = vsel %vm517_vm4, %v686_v10, %v687_v28  ;;  %v689_v36 = vsel %vm517_vm4, %v685_v26, %v686_v10 }
  0x63   : >> { %v695_v37 = vmul.f32 %v694_v29, %v690_v34  ;;  %v696_v39 = vmul.f32 %v694_v29, %v689_v36  ;;  %v697_v40 = vmul.f32 %v694_v29, %v688_v22  ;;  %v712_v41 = vmul.f32 %v1634_v30, %v711_v14 }
  0x64   : >> { %v713_v50 = vmul.f32 %v1637_v31, %v711_v14  ;;  %v714_v48 = vmul.f32 %v1642_v35, %v711_v14  ;;  %v718_v53 = vrot.slane %v1634_v30, 1  ;;  %v719_v54 = vrot.slane %v1637_v31, 1 }
  0x65   : >> { %v698_v45 = vadd.f32 %v695_v37, %v681_v32  ;;  %v699_v55 = vadd.f32 %v696_v39, %v682_v33  ;;  %v700_v56 = vadd.f32 %v697_v40, %v683_v16  ;;  %v720_v57 = vrot.slane %v1642_v35, 1 }
  0x66   : >> { %v721_v58 = vrot.slane %v1651_v38, 1  ;;  %v724_v60 = vsel %vm463_vm1, %v718_v53, %v719_v54  ;;  %v728_v61 = vrot.slane %v1323_v4, %v1445_v47  ;;  %v735_v62 = vrot.slane %v1634_v30, 2  ;;  %v1695_v53 = vld [vmem:[%s1429_s25 + $0x80] sm:$0xff] }
  0x67   : >> { %v715_v59 = vadd.f32 %v712_v41, %v698_v45  ;;  %v716_v63 = vadd.f32 %v713_v50, %v699_v55  ;;  %v717_v2 = vadd.f32 %v714_v48, %v700_v56  ;;  %v723_v9 = vsel %vm463_vm1, %v719_v54, %v720_v57  ;;  %v1702_v56 = vld [vmem:[%s1429_s25 + $0x88] sm:$0xff] }
  0x68   : >> { %v722_v43 = vsel %vm463_vm1, %v720_v57, %v721_v58  ;;  %v729_v11 = vmul.f32 %v728_v61, %v724_v60  ;;  %v730_v12 = vmul.f32 %v728_v61, %v723_v9  ;;  %v736_v44 = vrot.slane %v1637_v31, 2  ;;  %v1705_v57 = vld [vmem:[%s1429_s25 + $0x90] sm:$0xff] }
  0x69   : >> { %v731_v13 = vmul.f32 %v728_v61, %v722_v43  ;;  %v737_v49 = vrot.slane %v1642_v35, 2  ;;  %v738_v17 = vrot.slane %v1651_v38, 2  ;;  %v745_v52 = vrot.slane %v1323_v4, %v1475_v15 }
  0x6a   : >> { %v752_v18 = vrot.slane %v1634_v30, 3  ;;  %v732_v19 = vadd.f32 %v729_v11, %v715_v59  ;;  %v733_v20 = vadd.f32 %v730_v12, %v716_v63  ;;  %v741_v23 = vsel %vm481_vm2, %v735_v62, %v736_v44  ;;  %v1716_v63 = vld [vmem:[%s1429_s25 + $0x98] sm:$0xff] }
  0x6b   : >> { %v734_v21 = vadd.f32 %v731_v13, %v717_v2  ;;  %v739_v25 = vsel %vm481_vm2, %v737_v49, %v738_v17  ;;  %v740_v26 = vsel %vm481_vm2, %v736_v44, %v737_v49  ;;  %v746_v27 = vmul.f32 %v745_v52, %v741_v23 }
  0x6c   : >> { %v753_v10 = vrot.slane %v1637_v31, 3  ;;  %v747_v28 = vmul.f32 %v745_v52, %v740_v26  ;;  %v748_v29 = vmul.f32 %v745_v52, %v739_v25  ;;  %v754_v32 = vrot.slane %v1642_v35, 3 }
  0x6d   : >> { %v755_v33 = vrot.slane %v1651_v38, 3  ;;  %v749_v34 = vadd.f32 %v746_v27, %v732_v19  ;;  %v762_v16 = vrot.slane %v1323_v4, %v1484_v24  ;;  %v769_v22 = vrot.slane %v1634_v30, 4 }
  0x6e   : >> { %v758_v14 = vsel %vm499_vm3, %v752_v18, %v753_v10  ;;  %v750_v36 = vadd.f32 %v747_v28, %v733_v20  ;;  %v751_v37 = vadd.f32 %v748_v29, %v734_v21  ;;  %v757_v40 = vsel %vm499_vm3, %v753_v10, %v754_v32 }
  0x6f   : >> { %v756_v39 = vsel %vm499_vm3, %v754_v32, %v755_v33  ;;  %v763_v41 = vmul.f32 %v762_v16, %v758_v14  ;;  %v764_v50 = vmul.f32 %v762_v16, %v757_v40  ;;  %v770_v48 = vrot.slane %v1637_v31, 4 }
  0x70   : >> { %v765_v45 = vmul.f32 %v762_v16, %v756_v39  ;;  %v771_v54 = vrot.slane %v1642_v35, 4  ;;  %v772_v30 = vrot.slane %v1651_v38, 4  ;;  %v779_v55 = vrot.slane %v1323_v4, %v1514_v51 }
  0x71   : >> { %v796_v58 = vrot.slane %v1328_v5, %v1441_v46  ;;  %v766_v59 = vadd.f32 %v763_v41, %v749_v34  ;;  %v767_v60 = vadd.f32 %v764_v50, %v750_v36  ;;  %v775_v31 = vsel %vm517_vm4, %v769_v22, %v770_v48 }
  0x72   : >> { %v768_v61 = vadd.f32 %v765_v45, %v751_v37  ;;  %v773_v35 = vsel %vm517_vm4, %v771_v54, %v772_v30  ;;  %v774_v38 = vsel %vm517_vm4, %v770_v48, %v771_v54  ;;  %v780_v62 = vmul.f32 %v779_v55, %v775_v31 }
  0x73   : >> { %v797_v2 = vmul.f32 %v1695_v53, %v796_v58  ;;  %v781_v43 = vmul.f32 %v779_v55, %v774_v38  ;;  %v782_v9 = vmul.f32 %v779_v55, %v773_v35  ;;  %v798_v46 = vmul.f32 %v1702_v56, %v796_v58 }
  0x74   : >> { %v799_v11 = vmul.f32 %v1705_v57, %v796_v58  ;;  %v783_v12 = vadd.f32 %v780_v62, %v766_v59  ;;  %v803_v13 = vrot.slane %v1695_v53, 1  ;;  %v804_v44 = vrot.slane %v1702_v56, 1 }
  0x75   : >> { %v805_v49 = vrot.slane %v1705_v57, 1  ;;  %v784_v17 = vadd.f32 %v781_v43, %v767_v60  ;;  %v785_v52 = vadd.f32 %v782_v9, %v768_v61  ;;  %v806_v18 = vrot.slane %v1716_v63, 1 }
  0x76   : >> { %v813_v19 = vrot.slane %v1328_v5, %v1445_v47  ;;  %v800_v20 = vadd.f32 %v797_v2, %v783_v12  ;;  %v809_v23 = vsel %vm463_vm1, %v803_v13, %v804_v44  ;;  %v820_v25 = vrot.slane %v1695_v53, 2 }
  0x77   : >> { %v808_v21 = vsel %vm463_vm1, %v804_v44, %v805_v49  ;;  %v801_v26 = vadd.f32 %v798_v46, %v784_v17  ;;  %v802_v27 = vadd.f32 %v799_v11, %v785_v52  ;;  %v807_v10 = vsel %vm463_vm1, %v805_v49, %v806_v18 }
  0x78   : >> { %v814_v28 = vmul.f32 %v813_v19, %v809_v23  ;;  %v815_v29 = vmul.f32 %v813_v19, %v808_v21  ;;  %v816_v32 = vmul.f32 %v813_v19, %v807_v10  ;;  %v821_v33 = vrot.slane %v1702_v56, 2 }
  0x79   : >> { %v822_v47 = vrot.slane %v1705_v57, 2  ;;  %v823_v14 = vrot.slane %v1716_v63, 2  ;;  %v830_v16 = vrot.slane %v1328_v5, %v1475_v15  ;;  %v837_v22 = vrot.slane %v1695_v53, 3 }
  0x7a   : >> { %v817_v34 = vadd.f32 %v814_v28, %v800_v20  ;;  %v818_v36 = vadd.f32 %v815_v29, %v801_v26  ;;  %v819_v37 = vadd.f32 %v816_v32, %v802_v27  ;;  %v826_v40 = vsel %vm481_vm2, %v820_v25, %v821_v33  ;;  %v915_v28 = vld [vmem:[%s914_s27] sm:$0xff]  ;;  %v916_v29 = vld [vmem:[%s914_s27 + $0x8] sm:$0xff] }
  0x7b   : >> { %v825_v39 = vsel %vm481_vm2, %v821_v33, %v822_v47  ;;  %v824_v41 = vsel %vm481_vm2, %v822_v47, %v823_v14  ;;  %v831_v50 = vmul.f32 %v830_v16, %v826_v40  ;;  %v838_v48 = vrot.slane %v1702_v56, 3 }
  0x7c   : >> { %v832_v45 = vmul.f32 %v830_v16, %v825_v39  ;;  %v833_v54 = vmul.f32 %v830_v16, %v824_v41  ;;  %v839_v15 = vrot.slane %v1705_v57, 3  ;;  %v840_v30 = vrot.slane %v1716_v63, 3 }
  0x7d   : >> { %v847_v55 = vrot.slane %v1328_v5, %v1484_v24  ;;  %v834_v58 = vadd.f32 %v831_v50, %v817_v34  ;;  %v843_v60 = vsel %vm499_vm3, %v837_v22, %v838_v48  ;;  %v854_v61 = vrot.slane %v1695_v53, 4 }
  0x7e   : >> { %v835_v59 = vadd.f32 %v832_v45, %v818_v36  ;;  %v836_v31 = vadd.f32 %v833_v54, %v819_v37  ;;  %v841_v35 = vsel %vm499_vm3, %v839_v15, %v840_v30  ;;  %v842_v38 = vsel %vm499_vm3, %v838_v48, %v839_v15 }
  0x7f   : >> { %v848_v62 = vmul.f32 %v847_v55, %v843_v60  ;;  %v849_v2 = vmul.f32 %v847_v55, %v842_v38  ;;  %v850_v43 = vmul.f32 %v847_v55, %v841_v35  ;;  %v855_v9 = vrot.slane %v1702_v56, 4 }
  0x80   : >> { %v856_v24 = vrot.slane %v1705_v57, 4  ;;  %v857_v11 = vrot.slane %v1716_v63, 4  ;;  %v864_v53 = vrot.slane %v1328_v5, %v1514_v51  ;;  %v920_v36 = vrot.slane %v915_v28, 2 }
  0x81   : >> { %v851_v46 = vadd.f32 %v848_v62, %v834_v58  ;;  %v852_v12 = vadd.f32 %v849_v2, %v835_v59  ;;  %v853_v13 = vadd.f32 %v850_v43, %v836_v31  ;;  %v860_v49 = vsel %vm517_vm4, %v854_v61, %v855_v9 }
  0x82   : >> { %v859_v44 = vsel %vm517_vm4, %v855_v9, %v856_v24  ;;  %v858_v17 = vsel %vm517_vm4, %v856_v24, %v857_v11  ;;  %v865_v56 = vmul.f32 %v864_v53, %v860_v49  ;;  %v921_v37 = vrot.slane %v916_v29, 2 }
  0x83   : >> { %v866_v57 = vmul.f32 %v864_v53, %v859_v44  ;;  %v867_v52 = vmul.f32 %v864_v53, %v858_v17 }
  0x84   : >> { %v868_v63 = vadd.f32 %v865_v56, %v851_v46  ;;  %v922_v54 = vsel %vm919_vm5, %v920_v36, %v921_v37 }
  0x85   : >> { %v869_v18 = vadd.f32 %v866_v57, %v852_v12  ;;  %v870_v19 = vadd.f32 %v867_v52, %v853_v13 }
  0x86   : >> { %v877_v51 = vadd.f32 %v1333_v6, %v868_v63 }
  0x87   : >> { %v878_v20 = vadd.f32 %v1333_v6, %v869_v18  ;;  %v879_v21 = vadd.f32 %v1333_v6, %v870_v19 }
  0x88   : >> { %v883_v23 = vmul.f32 0.70710677, %v877_v51  ;;  %v880_v42 = vmul.f32 0.5, %v877_v51 }
  0x89   : >> { %v884_v25 = vmul.f32 0.70710677, %v878_v20  ;;  %v885_v26 = vmul.f32 0.70710677, %v879_v21  ;;  %v881_v10 = vmul.f32 0.5, %v878_v20  ;;  %v882_v33 = vmul.f32 0.5, %v879_v21 }
  0x8a   : >> { %1168 = verf.f32 %v883_v23 }
  0x8b   : >> { %1170 = verf.f32 %v884_v25 }
  0x8c   : >> { %1172 = verf.f32 %v885_v26 }
  0x94   : >> { %v1169_v27 = vpop.eup %1168 }
  0x95   : >> { %v1171_v32 = vpop.eup %1170  ;;  %v889_v47 = vadd.f32 1.0, %v1169_v27 }
  0x96   : >> { %v1173_v34 = vpop.eup %1172  ;;  %v890_v14 = vadd.f32 1.0, %v1171_v32 }
  0x97   : >> { %v891_v16 = vadd.f32 1.0, %v1173_v34  ;;  %v892_v22 = vmul.f32 %v889_v47, %v880_v42 }
  0x98   : >> { %v893_v39 = vmul.f32 %v890_v14, %v881_v10 }
  0x99   : >> { %v894_v40 = vmul.f32 %v891_v16, %v882_v33  ;;  %v901_v41 = vmul.f32 %v1338_v7, %v892_v22 }
  0x9a   : >> { %v902_v50 = vmul.f32 %v1338_v7, %v893_v39 }
  0x9b   : >> { %v903_v45 = vmul.f32 %v1338_v7, %v894_v40  ;;  %v910_v48 = vadd.f32 %v1343_v8, %v901_v41  ;;  %442 = sbr.rel (!%p440_p5) target bundleno = 47 (0x2f), region = 98 }
  0x9c   : >> { %v911_v15 = vadd.f32 %v1343_v8, %v902_v50 }
  0x9d   : >> { %v912_v30 = vadd.f32 %v1343_v8, %v903_v45  ;;  %v926_v55 = vadd.f32 %v920_v36, %v910_v48 }
  0x9e   : >> { %v927_v58 = vadd.f32 %v922_v54, %v911_v15 }
  0x9f   : >> { %v928_v59 = vadd.f32 %v921_v37, %v912_v30  ;;  %931 = vst.msk [vmem:[%s929_s28 - $0x6] sm:$0xc0] %vm930_vm6, %v926_v55 }
  0xa0   : >> { %932 = vst.msk [vmem:[%s929_s28 + $0x2] sm:$0xff] %vm315_vm0, %v927_v58 }
  0xa1   : >> { %934 = vst.msk [vmem:[%s929_s28 + $0xa] sm:$0x3f] %vm933_vm7, %v928_v59 }
  0xa2 PF: > { %s15_s20 = sadd.s32 1, %s1200_s20   ;;  %s1800_s18 = smov %s1196_s19 }
  0xa3   : > { %p12_p6 = scmp.ge.s32.totalorder %s15_s20, 4   ;;  %s1801_s19 = smov %s1803_s21 }
  0xa5   :  { %14 = sbr.rel (!%p12_p6) target bundleno = 2 (0x2), region = 109 }

</bundles_post_ra>
